<compile_context>
chip_gen: v6e
topology: v6e:2x2x1
jax: 0.10.0
libtpu: 0.0.40
codegen_flags: <defaults>
</compile_context>

<pallas_src>
import functools

import jax
import jax.numpy as jnp
import numpy as np
from jax.experimental import pallas as pl
from jax.experimental.pallas import tpu as pltpu


def _down_kernel(x_ref, m_ref, w1_ref, g1_ref, b1_ref, w2_ref, g2_ref, b2_ref,
                 o_ref, *, eps, wp):
    """Fused MaxPool2d(2) -> (conv3x3 -> BN -> ReLU) x 2.

    x_ref : (4, Cin, N) f32   -- the 4 pool-window slabs, N = B*Hp*Wp on lanes
    m_ref : (9, 1, N)  f32    -- per-tap 'same'-padding validity masks
    w*_ref: (9, Cout, Cin) bf16 -- 3x3 weights as 9 taps, t = 3*dh + dw
    g/b   : (C, 1) f32        -- BatchNorm affine parameters
    o_ref : (Cout, N) f32     -- lane-dense output
    """
    n = x_ref.shape[-1]

    # ---- MaxPool2d(2): plain VPU maxes of the 4 lane-dense window slabs ----
    pooled = jnp.maximum(jnp.maximum(x_ref[0], x_ref[1]),
                         jnp.maximum(x_ref[2], x_ref[3]))          # (Cin, N) f32

    offsets = [(oh, ow) for oh in (-1, 0, 1) for ow in (-1, 0, 1)]

    def conv3x3(act, w_ref):
        # 3x3 "same" conv as 9 accumulating MXU matmuls over lane-shifted
        # views of the flat (C, B*Hp*Wp) activation.  Shifts go to the XLU
        # (pltpu.roll), border masks to the VPU, so the store slot stays free.
        acc = None
        for t, (oh, ow) in enumerate(offsets):
            s = oh * wp + ow                       # flat lane offset of tap t
            shifted = act if s == 0 else pltpu.roll(act, (-s) % n, axis=1)
            if (oh, ow) != (0, 0):
                shifted = shifted * m_ref[t]       # zero padded-halo reads
            part = jax.lax.dot_general(
                w_ref[t], shifted.astype(jnp.bfloat16),
                (((1,), (0,)), ((), ())),
                preferred_element_type=jnp.float32)
            acc = part if acc is None else acc + part
        return acc                                  # (Cout, N) f32

    def bn_relu(acc, g_ref, b_ref):
        # Training-mode BatchNorm over all B*Hp*Wp columns (two-pass stats),
        # then ReLU.  Conv bias is omitted: it cancels in the mean subtraction.
        mu = jnp.mean(acc, axis=1, keepdims=True)
        var = jnp.mean(jnp.square(acc - mu), axis=1, keepdims=True)
        scale = g_ref[...] * jax.lax.rsqrt(var + eps)
        shift = b_ref[...] - mu * scale
        return jnp.maximum(acc * scale + shift, 0.0)

    acc1 = conv3x3(pooled, w1_ref)                  # conv1
    h1 = bn_relu(acc1, g1_ref, b1_ref)              # BN1 + ReLU   (Cmid, N) f32
    acc2 = conv3x3(h1, w2_ref)                      # conv2
    o_ref[...] = bn_relu(acc2, g2_ref, b2_ref)      # BN2 + ReLU, lane-dense store


def _vmem_limit_bytes(cin, cmid, cout, n):
    f32, bf16 = 4, 2
    io = (4 * cin * n * f32                          # pool-window input slabs
          + 9 * n * f32                              # border masks
          + 9 * (cmid * cin + cout * cmid) * bf16    # weights
          + 2 * (cmid + cout) * f32                  # BN params
          + cout * n * f32)                          # output
    live = (2 * cin + 4 * cmid + 4 * cout) * n * f32  # pooled/acc/h1/shift temps
    return int(min(max(2 * (io + live), 8 << 20), 64 << 20))


def down_forward(x_nchw, params, eps=1e-5):
    """Down.forward: x (B, Cin, H, W) -> (B, Cout, H/2, W/2)."""
    w1, _cb1, g1, be1, w2, _cb2, g2, be2 = params
    B, Cin, H, W = x_nchw.shape
    assert H % 2 == 0 and W % 2 == 0, "MaxPool2d(2) path assumes even H, W"
    Hp, Wp = H // 2, W // 2
    N = B * Hp * Wp
    Cmid, Cout = w1.shape[-1], w2.shape[-1]

    # ---- wrapper-side layout plumbing (pure XLA) ---------------------------
    # Channel-major, batch folded into the lane axis, 2x2 pool window exposed
    # as a leading axis of 4: every kernel load/store is lane-dense.
    x6 = x_nchw.astype(jnp.float32).reshape(B, Cin, Hp, 2, Wp, 2)
    xk = jnp.transpose(x6, (3, 5, 1, 0, 2, 4)).reshape(4, Cin, N)

    # 3x3 weights as 9 (Cout, Cin) taps, tap index t = 3*dh + dw; bf16 MXU
    # operands with f32 accumulation inside the kernel.
    w1r = jnp.transpose(w1.reshape(9, Cin, Cmid), (0, 2, 1)).astype(jnp.bfloat16)
    w2r = jnp.transpose(w2.reshape(9, Cmid, Cout), (0, 2, 1)).astype(jnp.bfloat16)
    g1c = g1.reshape(Cmid, 1).astype(jnp.float32)
    be1c = be1.reshape(Cmid, 1).astype(jnp.float32)
    g2c = g2.reshape(Cout, 1).astype(jnp.float32)
    be2c = be2.reshape(Cout, 1).astype(jnp.float32)
    # Conv biases (_cb1/_cb2) intentionally not passed: a per-channel additive
    # bias cancels exactly in the training-mode BN mean subtraction.

    # Per-tap "same"-padding validity masks over the flat (b, h, w) lane axis,
    # precomputed once (reused by both conv layers).
    idx = jnp.arange(N, dtype=jnp.int32)
    hpos = (idx % (Hp * Wp)) // Wp
    wpos = idx % Wp
    masks = []
    for oh in (-1, 0, 1):
        for ow in (-1, 0, 1):
            ok = ((hpos + oh >= 0) & (hpos + oh < Hp)
                  & (wpos + ow >= 0) & (wpos + ow < Wp))
            masks.append(ok)
    m = jnp.stack(masks).astype(jnp.float32).reshape(9, 1, N)

    kernel = functools.partial(_down_kernel, eps=eps, wp=Wp)
    vmem = pl.BlockSpec(memory_space=pltpu.MemorySpace.VMEM)
    out = pl.pallas_call(
        kernel,
        out_shape=jax.ShapeDtypeStruct((Cout, N), jnp.float32),
        in_specs=[vmem] * 8,
        out_specs=vmem,
        compiler_params=pltpu.CompilerParams(
            vmem_limit_bytes=_vmem_limit_bytes(Cin, Cmid, Cout, N)),
    )(xk, m, w1r, g1c, be1c, w2r, g2c, be2c)

    # (Cout, B*Hp*Wp) -> NCHW (wrapper-side layout plumbing).
    return jnp.transpose(out.reshape(Cout, B, Hp, Wp), (1, 0, 2, 3))


def make_params(key, in_channels, out_channels):
    """Deterministic synthetic parameters (DoubleConv: mid = out_channels)."""
    mid = out_channels
    ks = jax.random.split(key, 8)
    w1 = 0.1 * jax.random.normal(ks[0], (3, 3, in_channels, mid), jnp.float32)
    cb1 = 0.1 * jax.random.normal(ks[1], (1, mid), jnp.float32)
    g1 = 1.0 + 0.1 * jax.random.normal(ks[2], (1, mid), jnp.float32)
    be1 = 0.1 * jax.random.normal(ks[3], (1, mid), jnp.float32)
    w2 = 0.1 * jax.random.normal(ks[4], (3, 3, mid, out_channels), jnp.float32)
    cb2 = 0.1 * jax.random.normal(ks[5], (1, out_channels), jnp.float32)
    g2 = 1.0 + 0.1 * jax.random.normal(ks[6], (1, out_channels), jnp.float32)
    be2 = 0.1 * jax.random.normal(ks[7], (1, out_channels), jnp.float32)
    return (w1, cb1, g1, be1, w2, cb2, g2, be2)


def down_reference(x_nchw, params, eps=1e-5):
    """Pure-JAX reference mirroring torch Down.forward (training-mode BN)."""
    w1, cb1, g1, be1, w2, cb2, g2, be2 = params
    x = jnp.transpose(x_nchw, (0, 2, 3, 1))
    B, H, W, C = x.shape
    p = x.reshape(B, H // 2, 2, W // 2, 2, C).max(axis=(2, 4))

    def block(y, w, cb, g, be):
        y = jax.lax.conv_general_dilated(
            y, w, window_strides=(1, 1), padding="SAME",
            dimension_numbers=("NHWC", "HWIO", "NHWC"),
            precision=jax.lax.Precision.HIGHEST) + cb
        mu = jnp.mean(y, axis=(0, 1, 2), keepdims=True)
        var = jnp.mean((y - mu) ** 2, axis=(0, 1, 2), keepdims=True)
        return jnp.maximum((y - mu) / jnp.sqrt(var + eps) * g + be, 0.0)

    y = block(p, w1, cb1, g1, be1)
    y = block(y, w2, cb2, g2, be2)
    return jnp.transpose(y, (0, 3, 1, 2))


if __name__ == "__main__":
    key = jax.random.PRNGKey(0)
    kx, kp = jax.random.split(key)
    B, Cin, Cout, H, W = 2, 4, 8, 16, 16

    x = jax.random.normal(kx, (B, Cin, H, W), jnp.float32)
    params = make_params(kp, Cin, Cout)

    out = jax.block_until_ready(down_forward(x, params))
    ref = down_reference(x, params)

    assert out.shape == (B, Cout, H // 2, W // 2), out.shape
    # bf16 MXU operands (f32 accumulation / f32 BN stats) vs an f32
    # HIGHEST-precision reference -> bf16-appropriate tolerance.
    np.testing.assert_allclose(np.asarray(out), np.asarray(ref),
                               rtol=2e-2, atol=2e-2)
    print("KERNEL_OK")
</pallas_src>

<mosaic_0001>
module attributes {stable_mosaic.version = 11 : i64} {
  func.func @_down_kernel(%arg0: memref<4x4x128xf32, #tpu.memory_space<vmem>>, %arg1: memref<9x1x128xf32, #tpu.memory_space<vmem>>, %arg2: memref<9x8x4xbf16, #tpu.memory_space<vmem>>, %arg3: memref<8x1xf32, #tpu.memory_space<vmem>>, %arg4: memref<8x1xf32, #tpu.memory_space<vmem>>, %arg5: memref<9x8x8xbf16, #tpu.memory_space<vmem>>, %arg6: memref<8x1xf32, #tpu.memory_space<vmem>>, %arg7: memref<8x1xf32, #tpu.memory_space<vmem>>, %arg8: memref<8x128xf32, #tpu.memory_space<vmem>>) attributes {dimension_semantics = [], scalar_prefetch = 0 : i64, scratch_operands = 0 : i64, tpu.core_type = #tpu.core_type<tc>} {
    %c0 = arith.constant 0 : index
    %c0_0 = arith.constant 0 : index
    %c0_1 = arith.constant 0 : index
    %0 = vector.load %arg0[%c0, %c0_0, %c0_1] : memref<4x4x128xf32, #tpu.memory_space<vmem>>, vector<1x4x128xf32>
    %1 = vector.shape_cast %0 : vector<1x4x128xf32> to vector<4x128xf32>
    %c1 = arith.constant 1 : index
    %c0_2 = arith.constant 0 : index
    %c0_3 = arith.constant 0 : index
    %2 = vector.load %arg0[%c1, %c0_2, %c0_3] : memref<4x4x128xf32, #tpu.memory_space<vmem>>, vector<1x4x128xf32>
    %3 = vector.shape_cast %2 : vector<1x4x128xf32> to vector<4x128xf32>
    %4 = arith.maximumf %1, %3 : vector<4x128xf32>
    %c2 = arith.constant 2 : index
    %c0_4 = arith.constant 0 : index
    %c0_5 = arith.constant 0 : index
    %5 = vector.load %arg0[%c2, %c0_4, %c0_5] : memref<4x4x128xf32, #tpu.memory_space<vmem>>, vector<1x4x128xf32>
    %6 = vector.shape_cast %5 : vector<1x4x128xf32> to vector<4x128xf32>
    %c3 = arith.constant 3 : index
    %c0_6 = arith.constant 0 : index
    %c0_7 = arith.constant 0 : index
    %7 = vector.load %arg0[%c3, %c0_6, %c0_7] : memref<4x4x128xf32, #tpu.memory_space<vmem>>, vector<1x4x128xf32>
    %8 = vector.shape_cast %7 : vector<1x4x128xf32> to vector<4x128xf32>
    %9 = arith.maximumf %6, %8 : vector<4x128xf32>
    %10 = arith.maximumf %4, %9 : vector<4x128xf32>
    %c9_i32 = arith.constant 9 : i32
    %11 = tpu.dynamic_rotate %10 by %c9_i32 dim 1 : vector<4x128xf32>, i32 -> vector<4x128xf32>
    %c0_8 = arith.constant 0 : index
    %c0_9 = arith.constant 0 : index
    %c0_10 = arith.constant 0 : index
    %12 = vector.load %arg1[%c0_8, %c0_9, %c0_10] : memref<9x1x128xf32, #tpu.memory_space<vmem>>, vector<1x1x128xf32>
    %13 = vector.shape_cast %12 : vector<1x1x128xf32> to vector<1x128xf32>
    %14 = vector.broadcast %13 : vector<1x128xf32> to vector<4x128xf32>
    %15 = arith.mulf %11, %14 : vector<4x128xf32>
    %c0_11 = arith.constant 0 : index
    %c0_12 = arith.constant 0 : index
    %c0_13 = arith.constant 0 : index
    %16 = vector.load %arg2[%c0_11, %c0_12, %c0_13] : memref<9x8x4xbf16, #tpu.memory_space<vmem>>, vector<1x8x4xbf16>
    %17 = vector.shape_cast %16 : vector<1x8x4xbf16> to vector<8x4xbf16>
    %18 = arith.truncf %15 : vector<4x128xf32> to vector<4x128xbf16>
    %cst = arith.constant dense<0.000000e+00> : vector<8x128xf32>
    %19 = tpu.matmul %17, %18, %cst {dimension_numbers = #tpu.dot_dimension_numbers<[1], [0], [0], [1], [0, 0, 1, 1], [], []>} : vector<8x4xbf16>, vector<4x128xbf16>, vector<8x128xf32> -> vector<8x128xf32>
    %c8_i32 = arith.constant 8 : i32
    %20 = tpu.dynamic_rotate %10 by %c8_i32 dim 1 : vector<4x128xf32>, i32 -> vector<4x128xf32>
    %c1_14 = arith.constant 1 : index
    %c0_15 = arith.constant 0 : index
    %c0_16 = arith.constant 0 : index
    %21 = vector.load %arg1[%c1_14, %c0_15, %c0_16] : memref<9x1x128xf32, #tpu.memory_space<vmem>>, vector<1x1x128xf32>
    %22 = vector.shape_cast %21 : vector<1x1x128xf32> to vector<1x128xf32>
    %23 = vector.broadcast %22 : vector<1x128xf32> to vector<4x128xf32>
    %24 = arith.mulf %20, %23 : vector<4x128xf32>
    %c1_17 = arith.constant 1 : index
    %c0_18 = arith.constant 0 : index
    %c0_19 = arith.constant 0 : index
    %25 = vector.load %arg2[%c1_17, %c0_18, %c0_19] : memref<9x8x4xbf16, #tpu.memory_space<vmem>>, vector<1x8x4xbf16>
    %26 = vector.shape_cast %25 : vector<1x8x4xbf16> to vector<8x4xbf16>
    %27 = arith.truncf %24 : vector<4x128xf32> to vector<4x128xbf16>
    %cst_20 = arith.constant dense<0.000000e+00> : vector<8x128xf32>
    %28 = tpu.matmul %26, %27, %cst_20 {dimension_numbers = #tpu.dot_dimension_numbers<[1], [0], [0], [1], [0, 0, 1, 1], [], []>} : vector<8x4xbf16>, vector<4x128xbf16>, vector<8x128xf32> -> vector<8x128xf32>
    %29 = arith.addf %19, %28 : vector<8x128xf32>
    %c7_i32 = arith.constant 7 : i32
    %30 = tpu.dynamic_rotate %10 by %c7_i32 dim 1 : vector<4x128xf32>, i32 -> vector<4x128xf32>
    %c2_21 = arith.constant 2 : index
    %c0_22 = arith.constant 0 : index
    %c0_23 = arith.constant 0 : index
    %31 = vector.load %arg1[%c2_21, %c0_22, %c0_23] : memref<9x1x128xf32, #tpu.memory_space<vmem>>, vector<1x1x128xf32>
    %32 = vector.shape_cast %31 : vector<1x1x128xf32> to vector<1x128xf32>
    %33 = vector.broadcast %32 : vector<1x128xf32> to vector<4x128xf32>
    %34 = arith.mulf %30, %33 : vector<4x128xf32>
    %c2_24 = arith.constant 2 : index
    %c0_25 = arith.constant 0 : index
    %c0_26 = arith.constant 0 : index
    %35 = vector.load %arg2[%c2_24, %c0_25, %c0_26] : memref<9x8x4xbf16, #tpu.memory_space<vmem>>, vector<1x8x4xbf16>
    %36 = vector.shape_cast %35 : vector<1x8x4xbf16> to vector<8x4xbf16>
    %37 = arith.truncf %34 : vector<4x128xf32> to vector<4x128xbf16>
    %cst_27 = arith.constant dense<0.000000e+00> : vector<8x128xf32>
    %38 = tpu.matmul %36, %37, %cst_27 {dimension_numbers = #tpu.dot_dimension_numbers<[1], [0], [0], [1], [0, 0, 1, 1], [], []>} : vector<8x4xbf16>, vector<4x128xbf16>, vector<8x128xf32> -> vector<8x128xf32>
    %39 = arith.addf %29, %38 : vector<8x128xf32>
    %c1_i32 = arith.constant 1 : i32
    %40 = tpu.dynamic_rotate %10 by %c1_i32 dim 1 : vector<4x128xf32>, i32 -> vector<4x128xf32>
    %c3_28 = arith.constant 3 : index
    %c0_29 = arith.constant 0 : index
    %c0_30 = arith.constant 0 : index
    %41 = vector.load %arg1[%c3_28, %c0_29, %c0_30] : memref<9x1x128xf32, #tpu.memory_space<vmem>>, vector<1x1x128xf32>
    %42 = vector.shape_cast %41 : vector<1x1x128xf32> to vector<1x128xf32>
    %43 = vector.broadcast %42 : vector<1x128xf32> to vector<4x128xf32>
    %44 = arith.mulf %40, %43 : vector<4x128xf32>
    %c3_31 = arith.constant 3 : index
    %c0_32 = arith.constant 0 : index
    %c0_33 = arith.constant 0 : index
    %45 = vector.load %arg2[%c3_31, %c0_32, %c0_33] : memref<9x8x4xbf16, #tpu.memory_space<vmem>>, vector<1x8x4xbf16>
    %46 = vector.shape_cast %45 : vector<1x8x4xbf16> to vector<8x4xbf16>
    %47 = arith.truncf %44 : vector<4x128xf32> to vector<4x128xbf16>
    %cst_34 = arith.constant dense<0.000000e+00> : vector<8x128xf32>
    %48 = tpu.matmul %46, %47, %cst_34 {dimension_numbers = #tpu.dot_dimension_numbers<[1], [0], [0], [1], [0, 0, 1, 1], [], []>} : vector<8x4xbf16>, vector<4x128xbf16>, vector<8x128xf32> -> vector<8x128xf32>
    %49 = arith.addf %39, %48 : vector<8x128xf32>
    %c4 = arith.constant 4 : index
    %c0_35 = arith.constant 0 : index
    %c0_36 = arith.constant 0 : index
    %50 = vector.load %arg2[%c4, %c0_35, %c0_36] : memref<9x8x4xbf16, #tpu.memory_space<vmem>>, vector<1x8x4xbf16>
    %51 = vector.shape_cast %50 : vector<1x8x4xbf16> to vector<8x4xbf16>
    %52 = arith.truncf %10 : vector<4x128xf32> to vector<4x128xbf16>
    %cst_37 = arith.constant dense<0.000000e+00> : vector<8x128xf32>
    %53 = tpu.matmul %51, %52, %cst_37 {dimension_numbers = #tpu.dot_dimension_numbers<[1], [0], [0], [1], [0, 0, 1, 1], [], []>} : vector<8x4xbf16>, vector<4x128xbf16>, vector<8x128xf32> -> vector<8x128xf32>
    %54 = arith.addf %49, %53 : vector<8x128xf32>
    %c127_i32 = arith.constant 127 : i32
    %55 = tpu.dynamic_rotate %10 by %c127_i32 dim 1 : vector<4x128xf32>, i32 -> vector<4x128xf32>
    %c5 = arith.constant 5 : index
    %c0_38 = arith.constant 0 : index
    %c0_39 = arith.constant 0 : index
    %56 = vector.load %arg1[%c5, %c0_38, %c0_39] : memref<9x1x128xf32, #tpu.memory_space<vmem>>, vector<1x1x128xf32>
    %57 = vector.shape_cast %56 : vector<1x1x128xf32> to vector<1x128xf32>
    %58 = vector.broadcast %57 : vector<1x128xf32> to vector<4x128xf32>
    %59 = arith.mulf %55, %58 : vector<4x128xf32>
    %c5_40 = arith.constant 5 : index
    %c0_41 = arith.constant 0 : index
    %c0_42 = arith.constant 0 : index
    %60 = vector.load %arg2[%c5_40, %c0_41, %c0_42] : memref<9x8x4xbf16, #tpu.memory_space<vmem>>, vector<1x8x4xbf16>
    %61 = vector.shape_cast %60 : vector<1x8x4xbf16> to vector<8x4xbf16>
    %62 = arith.truncf %59 : vector<4x128xf32> to vector<4x128xbf16>
    %cst_43 = arith.constant dense<0.000000e+00> : vector<8x128xf32>
    %63 = tpu.matmul %61, %62, %cst_43 {dimension_numbers = #tpu.dot_dimension_numbers<[1], [0], [0], [1], [0, 0, 1, 1], [], []>} : vector<8x4xbf16>, vector<4x128xbf16>, vector<8x128xf32> -> vector<8x128xf32>
    %64 = arith.addf %54, %63 : vector<8x128xf32>
    %c121_i32 = arith.constant 121 : i32
    %65 = tpu.dynamic_rotate %10 by %c121_i32 dim 1 : vector<4x128xf32>, i32 -> vector<4x128xf32>
    %c6 = arith.constant 6 : index
    %c0_44 = arith.constant 0 : index
    %c0_45 = arith.constant 0 : index
    %66 = vector.load %arg1[%c6, %c0_44, %c0_45] : memref<9x1x128xf32, #tpu.memory_space<vmem>>, vector<1x1x128xf32>
    %67 = vector.shape_cast %66 : vector<1x1x128xf32> to vector<1x128xf32>
    %68 = vector.broadcast %67 : vector<1x128xf32> to vector<4x128xf32>
    %69 = arith.mulf %65, %68 : vector<4x128xf32>
    %c6_46 = arith.constant 6 : index
    %c0_47 = arith.constant 0 : index
    %c0_48 = arith.constant 0 : index
    %70 = vector.load %arg2[%c6_46, %c0_47, %c0_48] : memref<9x8x4xbf16, #tpu.memory_space<vmem>>, vector<1x8x4xbf16>
    %71 = vector.shape_cast %70 : vector<1x8x4xbf16> to vector<8x4xbf16>
    %72 = arith.truncf %69 : vector<4x128xf32> to vector<4x128xbf16>
    %cst_49 = arith.constant dense<0.000000e+00> : vector<8x128xf32>
    %73 = tpu.matmul %71, %72, %cst_49 {dimension_numbers = #tpu.dot_dimension_numbers<[1], [0], [0], [1], [0, 0, 1, 1], [], []>} : vector<8x4xbf16>, vector<4x128xbf16>, vector<8x128xf32> -> vector<8x128xf32>
    %74 = arith.addf %64, %73 : vector<8x128xf32>
    %c120_i32 = arith.constant 120 : i32
    %75 = tpu.dynamic_rotate %10 by %c120_i32 dim 1 : vector<4x128xf32>, i32 -> vector<4x128xf32>
    %c7 = arith.constant 7 : index
    %c0_50 = arith.constant 0 : index
    %c0_51 = arith.constant 0 : index
    %76 = vector.load %arg1[%c7, %c0_50, %c0_51] : memref<9x1x128xf32, #tpu.memory_space<vmem>>, vector<1x1x128xf32>
    %77 = vector.shape_cast %76 : vector<1x1x128xf32> to vector<1x128xf32>
    %78 = vector.broadcast %77 : vector<1x128xf32> to vector<4x128xf32>
    %79 = arith.mulf %75, %78 : vector<4x128xf32>
    %c7_52 = arith.constant 7 : index
    %c0_53 = arith.constant 0 : index
    %c0_54 = arith.constant 0 : index
    %80 = vector.load %arg2[%c7_52, %c0_53, %c0_54] : memref<9x8x4xbf16, #tpu.memory_space<vmem>>, vector<1x8x4xbf16>
    %81 = vector.shape_cast %80 : vector<1x8x4xbf16> to vector<8x4xbf16>
    %82 = arith.truncf %79 : vector<4x128xf32> to vector<4x128xbf16>
    %cst_55 = arith.constant dense<0.000000e+00> : vector<8x128xf32>
    %83 = tpu.matmul %81, %82, %cst_55 {dimension_numbers = #tpu.dot_dimension_numbers<[1], [0], [0], [1], [0, 0, 1, 1], [], []>} : vector<8x4xbf16>, vector<4x128xbf16>, vector<8x128xf32> -> vector<8x128xf32>
    %84 = arith.addf %74, %83 : vector<8x128xf32>
    %c119_i32 = arith.constant 119 : i32
    %85 = tpu.dynamic_rotate %10 by %c119_i32 dim 1 : vector<4x128xf32>, i32 -> vector<4x128xf32>
    %c8 = arith.constant 8 : index
    %c0_56 = arith.constant 0 : index
    %c0_57 = arith.constant 0 : index
    %86 = vector.load %arg1[%c8, %c0_56, %c0_57] : memref<9x1x128xf32, #tpu.memory_space<vmem>>, vector<1x1x128xf32>
    %87 = vector.shape_cast %86 : vector<1x1x128xf32> to vector<1x128xf32>
    %88 = vector.broadcast %87 : vector<1x128xf32> to vector<4x128xf32>
    %89 = arith.mulf %85, %88 : vector<4x128xf32>
    %c8_58 = arith.constant 8 : index
    %c0_59 = arith.constant 0 : index
    %c0_60 = arith.constant 0 : index
    %90 = vector.load %arg2[%c8_58, %c0_59, %c0_60] : memref<9x8x4xbf16, #tpu.memory_space<vmem>>, vector<1x8x4xbf16>
    %91 = vector.shape_cast %90 : vector<1x8x4xbf16> to vector<8x4xbf16>
    %92 = arith.truncf %89 : vector<4x128xf32> to vector<4x128xbf16>
    %cst_61 = arith.constant dense<0.000000e+00> : vector<8x128xf32>
    %93 = tpu.matmul %91, %92, %cst_61 {dimension_numbers = #tpu.dot_dimension_numbers<[1], [0], [0], [1], [0, 0, 1, 1], [], []>} : vector<8x4xbf16>, vector<4x128xbf16>, vector<8x128xf32> -> vector<8x128xf32>
    %94 = arith.addf %84, %93 : vector<8x128xf32>
    %cst_62 = arith.constant dense<0.000000e+00> : vector<8xf32>
    %95 = vector.multi_reduction <add>, %94, %cst_62 [1] : vector<8x128xf32> to vector<8xf32>
    %96 = vector.shape_cast %95 : vector<8xf32> to vector<8x1xf32>
    %cst_63 = arith.constant 1.280000e+02 : f32
    %97 = vector.broadcast %cst_63 : f32 to vector<8x1xf32>
    %98 = arith.divf %96, %97 : vector<8x1xf32>
    %99 = vector.broadcast %98 : vector<8x1xf32> to vector<8x128xf32>
    %100 = arith.subf %94, %99 : vector<8x128xf32>
    %101 = arith.mulf %100, %100 : vector<8x128xf32>
    %cst_64 = arith.constant dense<0.000000e+00> : vector<8xf32>
    %102 = vector.multi_reduction <add>, %101, %cst_64 [1] : vector<8x128xf32> to vector<8xf32>
    %103 = vector.shape_cast %102 : vector<8xf32> to vector<8x1xf32>
    %cst_65 = arith.constant 1.280000e+02 : f32
    %104 = vector.broadcast %cst_65 : f32 to vector<8x1xf32>
    %105 = arith.divf %103, %104 : vector<8x1xf32>
    %c0_66 = arith.constant 0 : index
    %c0_67 = arith.constant 0 : index
    %106 = vector.load %arg3[%c0_66, %c0_67] : memref<8x1xf32, #tpu.memory_space<vmem>>, vector<8x1xf32>
    %cst_68 = arith.constant 9.99999974E-6 : f32
    %107 = vector.broadcast %cst_68 : f32 to vector<8x1xf32>
    %108 = arith.addf %105, %107 : vector<8x1xf32>
    %109 = math.rsqrt %108 : vector<8x1xf32>
    %110 = arith.mulf %106, %109 : vector<8x1xf32>
    %c0_69 = arith.constant 0 : index
    %c0_70 = arith.constant 0 : index
    %111 = vector.load %arg4[%c0_69, %c0_70] : memref<8x1xf32, #tpu.memory_space<vmem>>, vector<8x1xf32>
    %112 = arith.mulf %98, %110 : vector<8x1xf32>
    %113 = arith.subf %111, %112 : vector<8x1xf32>
    %114 = vector.broadcast %110 : vector<8x1xf32> to vector<8x128xf32>
    %115 = arith.mulf %94, %114 : vector<8x128xf32>
    %116 = vector.broadcast %113 : vector<8x1xf32> to vector<8x128xf32>
    %117 = arith.addf %115, %116 : vector<8x128xf32>
    %cst_71 = arith.constant 0.000000e+00 : f32
    %118 = vector.broadcast %cst_71 : f32 to vector<8x128xf32>
    %119 = arith.maximumf %117, %118 : vector<8x128xf32>
    %c9_i32_72 = arith.constant 9 : i32
    %120 = tpu.dynamic_rotate %119 by %c9_i32_72 dim 1 : vector<8x128xf32>, i32 -> vector<8x128xf32>
    %c0_73 = arith.constant 0 : index
    %c0_74 = arith.constant 0 : index
    %c0_75 = arith.constant 0 : index
    %121 = vector.load %arg1[%c0_73, %c0_74, %c0_75] : memref<9x1x128xf32, #tpu.memory_space<vmem>>, vector<1x1x128xf32>
    %122 = vector.shape_cast %121 : vector<1x1x128xf32> to vector<1x128xf32>
    %123 = vector.broadcast %122 : vector<1x128xf32> to vector<8x128xf32>
    %124 = arith.mulf %120, %123 : vector<8x128xf32>
    %c0_76 = arith.constant 0 : index
    %c0_77 = arith.constant 0 : index
    %c0_78 = arith.constant 0 : index
    %125 = vector.load %arg5[%c0_76, %c0_77, %c0_78] : memref<9x8x8xbf16, #tpu.memory_space<vmem>>, vector<1x8x8xbf16>
    %126 = vector.shape_cast %125 : vector<1x8x8xbf16> to vector<8x8xbf16>
    %127 = arith.truncf %124 : vector<8x128xf32> to vector<8x128xbf16>
    %cst_79 = arith.constant dense<0.000000e+00> : vector<8x128xf32>
    %128 = tpu.matmul %126, %127, %cst_79 {dimension_numbers = #tpu.dot_dimension_numbers<[1], [0], [0], [1], [0, 0, 1, 1], [], []>} : vector<8x8xbf16>, vector<8x128xbf16>, vector<8x128xf32> -> vector<8x128xf32>
    %c8_i32_80 = arith.constant 8 : i32
    %129 = tpu.dynamic_rotate %119 by %c8_i32_80 dim 1 : vector<8x128xf32>, i32 -> vector<8x128xf32>
    %c1_81 = arith.constant 1 : index
    %c0_82 = arith.constant 0 : index
    %c0_83 = arith.constant 0 : index
    %130 = vector.load %arg1[%c1_81, %c0_82, %c0_83] : memref<9x1x128xf32, #tpu.memory_space<vmem>>, vector<1x1x128xf32>
    %131 = vector.shape_cast %130 : vector<1x1x128xf32> to vector<1x128xf32>
    %132 = vector.broadcast %131 : vector<1x128xf32> to vector<8x128xf32>
    %133 = arith.mulf %129, %132 : vector<8x128xf32>
    %c1_84 = arith.constant 1 : index
    %c0_85 = arith.constant 0 : index
    %c0_86 = arith.constant 0 : index
    %134 = vector.load %arg5[%c1_84, %c0_85, %c0_86] : memref<9x8x8xbf16, #tpu.memory_space<vmem>>, vector<1x8x8xbf16>
    %135 = vector.shape_cast %134 : vector<1x8x8xbf16> to vector<8x8xbf16>
    %136 = arith.truncf %133 : vector<8x128xf32> to vector<8x128xbf16>
    %cst_87 = arith.constant dense<0.000000e+00> : vector<8x128xf32>
    %137 = tpu.matmul %135, %136, %cst_87 {dimension_numbers = #tpu.dot_dimension_numbers<[1], [0], [0], [1], [0, 0, 1, 1], [], []>} : vector<8x8xbf16>, vector<8x128xbf16>, vector<8x128xf32> -> vector<8x128xf32>
    %138 = arith.addf %128, %137 : vector<8x128xf32>
    %c7_i32_88 = arith.constant 7 : i32
    %139 = tpu.dynamic_rotate %119 by %c7_i32_88 dim 1 : vector<8x128xf32>, i32 -> vector<8x128xf32>
    %c2_89 = arith.constant 2 : index
    %c0_90 = arith.constant 0 : index
    %c0_91 = arith.constant 0 : index
    %140 = vector.load %arg1[%c2_89, %c0_90, %c0_91] : memref<9x1x128xf32, #tpu.memory_space<vmem>>, vector<1x1x128xf32>
    %141 = vector.shape_cast %140 : vector<1x1x128xf32> to vector<1x128xf32>
    %142 = vector.broadcast %141 : vector<1x128xf32> to vector<8x128xf32>
    %143 = arith.mulf %139, %142 : vector<8x128xf32>
    %c2_92 = arith.constant 2 : index
    %c0_93 = arith.constant 0 : index
    %c0_94 = arith.constant 0 : index
    %144 = vector.load %arg5[%c2_92, %c0_93, %c0_94] : memref<9x8x8xbf16, #tpu.memory_space<vmem>>, vector<1x8x8xbf16>
    %145 = vector.shape_cast %144 : vector<1x8x8xbf16> to vector<8x8xbf16>
    %146 = arith.truncf %143 : vector<8x128xf32> to vector<8x128xbf16>
    %cst_95 = arith.constant dense<0.000000e+00> : vector<8x128xf32>
    %147 = tpu.matmul %145, %146, %cst_95 {dimension_numbers = #tpu.dot_dimension_numbers<[1], [0], [0], [1], [0, 0, 1, 1], [], []>} : vector<8x8xbf16>, vector<8x128xbf16>, vector<8x128xf32> -> vector<8x128xf32>
    %148 = arith.addf %138, %147 : vector<8x128xf32>
    %c1_i32_96 = arith.constant 1 : i32
    %149 = tpu.dynamic_rotate %119 by %c1_i32_96 dim 1 : vector<8x128xf32>, i32 -> vector<8x128xf32>
    %c3_97 = arith.constant 3 : index
    %c0_98 = arith.constant 0 : index
    %c0_99 = arith.constant 0 : index
    %150 = vector.load %arg1[%c3_97, %c0_98, %c0_99] : memref<9x1x128xf32, #tpu.memory_space<vmem>>, vector<1x1x128xf32>
    %151 = vector.shape_cast %150 : vector<1x1x128xf32> to vector<1x128xf32>
    %152 = vector.broadcast %151 : vector<1x128xf32> to vector<8x128xf32>
    %153 = arith.mulf %149, %152 : vector<8x128xf32>
    %c3_100 = arith.constant 3 : index
    %c0_101 = arith.constant 0 : index
    %c0_102 = arith.constant 0 : index
    %154 = vector.load %arg5[%c3_100, %c0_101, %c0_102] : memref<9x8x8xbf16, #tpu.memory_space<vmem>>, vector<1x8x8xbf16>
    %155 = vector.shape_cast %154 : vector<1x8x8xbf16> to vector<8x8xbf16>
    %156 = arith.truncf %153 : vector<8x128xf32> to vector<8x128xbf16>
    %cst_103 = arith.constant dense<0.000000e+00> : vector<8x128xf32>
    %157 = tpu.matmul %155, %156, %cst_103 {dimension_numbers = #tpu.dot_dimension_numbers<[1], [0], [0], [1], [0, 0, 1, 1], [], []>} : vector<8x8xbf16>, vector<8x128xbf16>, vector<8x128xf32> -> vector<8x128xf32>
    %158 = arith.addf %148, %157 : vector<8x128xf32>
    %c4_104 = arith.constant 4 : index
    %c0_105 = arith.constant 0 : index
    %c0_106 = arith.constant 0 : index
    %159 = vector.load %arg5[%c4_104, %c0_105, %c0_106] : memref<9x8x8xbf16, #tpu.memory_space<vmem>>, vector<1x8x8xbf16>
    %160 = vector.shape_cast %159 : vector<1x8x8xbf16> to vector<8x8xbf16>
    %161 = arith.truncf %119 : vector<8x128xf32> to vector<8x128xbf16>
    %cst_107 = arith.constant dense<0.000000e+00> : vector<8x128xf32>
    %162 = tpu.matmul %160, %161, %cst_107 {dimension_numbers = #tpu.dot_dimension_numbers<[1], [0], [0], [1], [0, 0, 1, 1], [], []>} : vector<8x8xbf16>, vector<8x128xbf16>, vector<8x128xf32> -> vector<8x128xf32>
    %163 = arith.addf %158, %162 : vector<8x128xf32>
    %c127_i32_108 = arith.constant 127 : i32
    %164 = tpu.dynamic_rotate %119 by %c127_i32_108 dim 1 : vector<8x128xf32>, i32 -> vector<8x128xf32>
    %c5_109 = arith.constant 5 : index
    %c0_110 = arith.constant 0 : index
    %c0_111 = arith.constant 0 : index
    %165 = vector.load %arg1[%c5_109, %c0_110, %c0_111] : memref<9x1x128xf32, #tpu.memory_space<vmem>>, vector<1x1x128xf32>
    %166 = vector.shape_cast %165 : vector<1x1x128xf32> to vector<1x128xf32>
    %167 = vector.broadcast %166 : vector<1x128xf32> to vector<8x128xf32>
    %168 = arith.mulf %164, %167 : vector<8x128xf32>
    %c5_112 = arith.constant 5 : index
    %c0_113 = arith.constant 0 : index
    %c0_114 = arith.constant 0 : index
    %169 = vector.load %arg5[%c5_112, %c0_113, %c0_114] : memref<9x8x8xbf16, #tpu.memory_space<vmem>>, vector<1x8x8xbf16>
    %170 = vector.shape_cast %169 : vector<1x8x8xbf16> to vector<8x8xbf16>
    %171 = arith.truncf %168 : vector<8x128xf32> to vector<8x128xbf16>
    %cst_115 = arith.constant dense<0.000000e+00> : vector<8x128xf32>
    %172 = tpu.matmul %170, %171, %cst_115 {dimension_numbers = #tpu.dot_dimension_numbers<[1], [0], [0], [1], [0, 0, 1, 1], [], []>} : vector<8x8xbf16>, vector<8x128xbf16>, vector<8x128xf32> -> vector<8x128xf32>
    %173 = arith.addf %163, %172 : vector<8x128xf32>
    %c121_i32_116 = arith.constant 121 : i32
    %174 = tpu.dynamic_rotate %119 by %c121_i32_116 dim 1 : vector<8x128xf32>, i32 -> vector<8x128xf32>
    %c6_117 = arith.constant 6 : index
    %c0_118 = arith.constant 0 : index
    %c0_119 = arith.constant 0 : index
    %175 = vector.load %arg1[%c6_117, %c0_118, %c0_119] : memref<9x1x128xf32, #tpu.memory_space<vmem>>, vector<1x1x128xf32>
    %176 = vector.shape_cast %175 : vector<1x1x128xf32> to vector<1x128xf32>
    %177 = vector.broadcast %176 : vector<1x128xf32> to vector<8x128xf32>
    %178 = arith.mulf %174, %177 : vector<8x128xf32>
    %c6_120 = arith.constant 6 : index
    %c0_121 = arith.constant 0 : index
    %c0_122 = arith.constant 0 : index
    %179 = vector.load %arg5[%c6_120, %c0_121, %c0_122] : memref<9x8x8xbf16, #tpu.memory_space<vmem>>, vector<1x8x8xbf16>
    %180 = vector.shape_cast %179 : vector<1x8x8xbf16> to vector<8x8xbf16>
    %181 = arith.truncf %178 : vector<8x128xf32> to vector<8x128xbf16>
    %cst_123 = arith.constant dense<0.000000e+00> : vector<8x128xf32>
    %182 = tpu.matmul %180, %181, %cst_123 {dimension_numbers = #tpu.dot_dimension_numbers<[1], [0], [0], [1], [0, 0, 1, 1], [], []>} : vector<8x8xbf16>, vector<8x128xbf16>, vector<8x128xf32> -> vector<8x128xf32>
    %183 = arith.addf %173, %182 : vector<8x128xf32>
    %c120_i32_124 = arith.constant 120 : i32
    %184 = tpu.dynamic_rotate %119 by %c120_i32_124 dim 1 : vector<8x128xf32>, i32 -> vector<8x128xf32>
    %c7_125 = arith.constant 7 : index
    %c0_126 = arith.constant 0 : index
    %c0_127 = arith.constant 0 : index
    %185 = vector.load %arg1[%c7_125, %c0_126, %c0_127] : memref<9x1x128xf32, #tpu.memory_space<vmem>>, vector<1x1x128xf32>
    %186 = vector.shape_cast %185 : vector<1x1x128xf32> to vector<1x128xf32>
    %187 = vector.broadcast %186 : vector<1x128xf32> to vector<8x128xf32>
    %188 = arith.mulf %184, %187 : vector<8x128xf32>
    %c7_128 = arith.constant 7 : index
    %c0_129 = arith.constant 0 : index
    %c0_130 = arith.constant 0 : index
    %189 = vector.load %arg5[%c7_128, %c0_129, %c0_130] : memref<9x8x8xbf16, #tpu.memory_space<vmem>>, vector<1x8x8xbf16>
    %190 = vector.shape_cast %189 : vector<1x8x8xbf16> to vector<8x8xbf16>
    %191 = arith.truncf %188 : vector<8x128xf32> to vector<8x128xbf16>
    %cst_131 = arith.constant dense<0.000000e+00> : vector<8x128xf32>
    %192 = tpu.matmul %190, %191, %cst_131 {dimension_numbers = #tpu.dot_dimension_numbers<[1], [0], [0], [1], [0, 0, 1, 1], [], []>} : vector<8x8xbf16>, vector<8x128xbf16>, vector<8x128xf32> -> vector<8x128xf32>
    %193 = arith.addf %183, %192 : vector<8x128xf32>
    %c119_i32_132 = arith.constant 119 : i32
    %194 = tpu.dynamic_rotate %119 by %c119_i32_132 dim 1 : vector<8x128xf32>, i32 -> vector<8x128xf32>
    %c8_133 = arith.constant 8 : index
    %c0_134 = arith.constant 0 : index
    %c0_135 = arith.constant 0 : index
    %195 = vector.load %arg1[%c8_133, %c0_134, %c0_135] : memref<9x1x128xf32, #tpu.memory_space<vmem>>, vector<1x1x128xf32>
    %196 = vector.shape_cast %195 : vector<1x1x128xf32> to vector<1x128xf32>
    %197 = vector.broadcast %196 : vector<1x128xf32> to vector<8x128xf32>
    %198 = arith.mulf %194, %197 : vector<8x128xf32>
    %c8_136 = arith.constant 8 : index
    %c0_137 = arith.constant 0 : index
    %c0_138 = arith.constant 0 : index
    %199 = vector.load %arg5[%c8_136, %c0_137, %c0_138] : memref<9x8x8xbf16, #tpu.memory_space<vmem>>, vector<1x8x8xbf16>
    %200 = vector.shape_cast %199 : vector<1x8x8xbf16> to vector<8x8xbf16>
    %201 = arith.truncf %198 : vector<8x128xf32> to vector<8x128xbf16>
    %cst_139 = arith.constant dense<0.000000e+00> : vector<8x128xf32>
    %202 = tpu.matmul %200, %201, %cst_139 {dimension_numbers = #tpu.dot_dimension_numbers<[1], [0], [0], [1], [0, 0, 1, 1], [], []>} : vector<8x8xbf16>, vector<8x128xbf16>, vector<8x128xf32> -> vector<8x128xf32>
    %203 = arith.addf %193, %202 : vector<8x128xf32>
    %cst_140 = arith.constant dense<0.000000e+00> : vector<8xf32>
    %204 = vector.multi_reduction <add>, %203, %cst_140 [1] : vector<8x128xf32> to vector<8xf32>
    %205 = vector.shape_cast %204 : vector<8xf32> to vector<8x1xf32>
    %cst_141 = arith.constant 1.280000e+02 : f32
    %206 = vector.broadcast %cst_141 : f32 to vector<8x1xf32>
    %207 = arith.divf %205, %206 : vector<8x1xf32>
    %208 = vector.broadcast %207 : vector<8x1xf32> to vector<8x128xf32>
    %209 = arith.subf %203, %208 : vector<8x128xf32>
    %210 = arith.mulf %209, %209 : vector<8x128xf32>
    %cst_142 = arith.constant dense<0.000000e+00> : vector<8xf32>
    %211 = vector.multi_reduction <add>, %210, %cst_142 [1] : vector<8x128xf32> to vector<8xf32>
    %212 = vector.shape_cast %211 : vector<8xf32> to vector<8x1xf32>
    %cst_143 = arith.constant 1.280000e+02 : f32
    %213 = vector.broadcast %cst_143 : f32 to vector<8x1xf32>
    %214 = arith.divf %212, %213 : vector<8x1xf32>
    %c0_144 = arith.constant 0 : index
    %c0_145 = arith.constant 0 : index
    %215 = vector.load %arg6[%c0_144, %c0_145] : memref<8x1xf32, #tpu.memory_space<vmem>>, vector<8x1xf32>
    %cst_146 = arith.constant 9.99999974E-6 : f32
    %216 = vector.broadcast %cst_146 : f32 to vector<8x1xf32>
    %217 = arith.addf %214, %216 : vector<8x1xf32>
    %218 = math.rsqrt %217 : vector<8x1xf32>
    %219 = arith.mulf %215, %218 : vector<8x1xf32>
    %c0_147 = arith.constant 0 : index
    %c0_148 = arith.constant 0 : index
    %220 = vector.load %arg7[%c0_147, %c0_148] : memref<8x1xf32, #tpu.memory_space<vmem>>, vector<8x1xf32>
    %221 = arith.mulf %207, %219 : vector<8x1xf32>
    %222 = arith.subf %220, %221 : vector<8x1xf32>
    %223 = vector.broadcast %219 : vector<8x1xf32> to vector<8x128xf32>
    %224 = arith.mulf %203, %223 : vector<8x128xf32>
    %225 = vector.broadcast %222 : vector<8x1xf32> to vector<8x128xf32>
    %226 = arith.addf %224, %225 : vector<8x128xf32>
    %cst_149 = arith.constant 0.000000e+00 : f32
    %227 = vector.broadcast %cst_149 : f32 to vector<8x128xf32>
    %228 = arith.maximumf %226, %227 : vector<8x128xf32>
    %c0_150 = arith.constant 0 : index
    %c0_151 = arith.constant 0 : index
    %229 = vector.load %arg8[%c0_150, %c0_151] : memref<8x128xf32, #tpu.memory_space<vmem>>, vector<8x128xf32>
    tpu.vector_store %arg8[%c0_150, %c0_151], %228 {strides = array<i32>} : memref<8x128xf32, #tpu.memory_space<vmem>>, vector<8x128xf32>,
    return
  }
}

</mosaic_0001>

<bundles_post_ra>
// kernel: tpu_custom_call.1
= control target key start
LH: loop header
LB: loop body
LE: loop exit
PB: predicated region body
PF: predicated region fallthrough
CT: control target
= control target key end

     0   :  { %v1358_v6 = vmov 0.0   ;;  %vm1359_vm0 = vmmov 0   ;;  %s1670_s0 = inlined_call_operand.vmem [shape: f32[4,4,128], index: 0, kind: input, shape index: {}]   ;;  %s1671_s1 = inlined_call_operand.vmem [shape: f32[9,1,128], index: 1, kind: input, shape index: {}]   ;;  %s1672_s2 = inlined_call_operand.vmem [shape: bf16[9,8,4], index: 2, kind: input, shape index: {}]   ;;  %s1673_s3 = inlined_call_operand.vmem [shape: f32[8,1], index: 3, kind: input, shape index: {}]   ;;  %s1674_s4 = inlined_call_operand.vmem [shape: f32[8,1], index: 4, kind: input, shape index: {}]   ;;  %s1675_s5 = inlined_call_operand.vmem [shape: bf16[9,8,8], index: 5, kind: input, shape index: {}]   ;;  %s1676_s6 = inlined_call_operand.vmem [shape: f32[8,1], index: 6, kind: input, shape index: {}]   ;;  %s1677_s7 = inlined_call_operand.vmem [shape: f32[8,1], index: 7, kind: input, shape index: {}]   ;;  %s1678_s8 = inlined_call_operand.hbm [shape: f32[8,128], index: 8, kind: output, shape index: {}]  }
   0x1   :  { %v31_v0 = vld [vmem:[%s1670_s0] sm:$0xf]  ;;  %v1122_v1 = vld [vmem:[%s1670_s0 + $0x4] sm:$0xf]  ;;  %v1123_v2 = vld [vmem:[%s1670_s0 + $0x8] sm:$0xf]  ;;  %1210 = vmatprep.subr.bf16.mxu0 %v1358_v6  ;;  %1216 = vmatprep.subr.bf16.mxu1 %v1358_v6 }
   0x2   :  { %v34_v3 = vmax.f32 %v31_v0, %v1122_v1  ;;  %v1124_v4 = vld [vmem:[%s1670_s0 + $0xc] sm:$0xf]  ;;  %1212 = vmatprep.mubr.msk.bf16.mxu0 %vm1359_vm0, %v1358_v6  ;;  %1218 = vmatprep.mubr.msk.bf16.mxu1 %vm1359_vm0, %v1358_v6 }
   0x3   :  { %v39_v5 = vmax.f32 %v1123_v2, %v1124_v4 }
   0x5   :  { %v1429_v7 = vmax.f32 %v34_v3, %v39_v5 }
   0x6   :  { %13 = vsyncpa [#allocation3], 0  ;;  %s1360_s13 = smov 8   ;;  %s1361_s0 = smov 7   ;;  %v1454_v8 = vld [vmem:[%s1671_s1 + $0x1] ss:$0 sm:$0xff] }
   0x7   :  { %53 = vrot.lane.b32.xlu0 %v1429_v7, %s1360_s13  ;;  %161 = vrot.lane.b32.xlu1 %v1429_v7, %s1361_s0  ;;  %s1362_s14 = smov 9   ;;  %s1363_s15 = smov 1   ;;  %v1459_v9 = vld [vmem:[%s1671_s1 + $0x2] ss:$0 sm:$0xff]  ;;  %v1466_v14 = vld [vmem:[%s1671_s1] ss:$0 sm:$0xff]  ;;  %v285_v33 = vpack.c.bf16 %v1429_v7, %v1429_v7 }
   0x8   :  { %s1364_s16 = smov 127   ;;  %s1365_s17 = smov 121   ;;  %vm71_vm1 = vcmask 1041408   ;;  %v1471_v15 = vld [vmem:[%s1671_s1 + $0x3] ss:$0 sm:$0xff]  ;;  %vm67_vm2 = vcmask 31744  }
   0x9   :  { %s1366_s18 = smov 120   ;;  %s1367_s19 = smov 119   ;;  %v1128_v23 = vld [vmem:[%s1672_s2 + $0x4] sm:$0xf]  ;;  %v51_v30 = vld [vmem:[%s1672_s2] sm:$0xf] }
   0xa   :  { %v1484_v27 = vld [vmem:[%s1671_s1 + $0x5] ss:$0 sm:$0xff]  ;;  %v1502_v34 = vld [vmem:[%s1671_s1 + $0x6] ss:$0 sm:$0xff]  ;;  %v1133_v36 = vld [vmem:[%s1672_s2 + $0x8] sm:$0xf] }
   0xb   :  { %41 = vrot.lane.b32.xlu0 %v1429_v7, %s1362_s14  ;;  %222 = vrot.lane.b32.xlu1 %v1429_v7, %s1363_s15  ;;  %v290_v38 = vsel %vm71_vm1, %v285_v33, 0  ;;  %v1516_v40 = vld [vmem:[%s1671_s1 + $0x7] ss:$0 sm:$0xff]  ;;  %v1137_v42 = vld [vmem:[%s1672_s2 + $0xc] sm:$0xf]  ;;  %vm621_vm3 = vcmask 1043456  }
   0xc   :  { %v1530_v46 = vld [vmem:[%s1671_s1 + $0x8] ss:$0 sm:$0xff]  ;;  %v1139_v48 = vld [vmem:[%s1672_s2 + $0x10] sm:$0xf]  ;;  %v1143_v52 = vld [vmem:[%s1672_s2 + $0x14] sm:$0xf] }
   0xd   :  { %v1147_v55 = vld [vmem:[%s1672_s2 + $0x18] sm:$0xf]  ;;  %v1151_v57 = vld [vmem:[%s1672_s2 + $0x1c] sm:$0xf]  ;;  %v1155_v58 = vld [vmem:[%s1672_s2 + $0x20] sm:$0xf] }
   0xe   :  { %vm617_vm4 = vcmask 64512   ;;  %s1369_s21 = smov [#allocation2]  }
   0xf   :  { %333 = vrot.lane.b32.xlu0 %v1429_v7, %s1364_s16  ;;  %394 = vrot.lane.b32.xlu1 %v1429_v7, %s1365_s17  ;;  %s1114_s22 = sshll.u32 %s1369_s21, 4  ;;  %s1115_s22 = int_to_ptr.vmem [resolvable:$true] %s1114_s22 }
  0x10   :  { %p1341_p1 = scmp.lt.s32.totalorder %s1115_s22, %s1115_s22 }
  0x13   :  { %455 = vrot.lane.b32.xlu0 %v1429_v7, %s1366_s18  ;;  %516 = vrot.lane.b32.xlu1 %v1429_v7, %s1367_s19 }
  0x79   :  { %v54_v10 = vpop.permute.xlu0 %53  ;;  %v162_v11 = vpop.permute.xlu1 %161 }
  0x7a   :  { %v63_v12 = vmul.f32 %v1454_v8, %v54_v10  ;;  %v171_v13 = vmul.f32 %v1459_v9, %v162_v11 }
  0x7c   :  { %v66_v16 = vpack.c.bf16 %v63_v12, %v63_v12  ;;  %v174_v17 = vpack.c.bf16 %v171_v13, %v171_v13 }
  0x7d   :  { %v42_v18 = vpop.permute.xlu0 %41  ;;  %v223_v19 = vpop.permute.xlu1 %222 }
  0x7e   :  { %v50_v20 = vmul.f32 %v1466_v14, %v42_v18  ;;  %v73_v21 = vsel %vm71_vm1, %v66_v16, 0  ;;  %v232_v22 = vmul.f32 %v1471_v15, %v223_v19  ;;  %v179_v25 = vsel %vm71_vm1, %v174_v17, 0 }
  0x7f   :  { %1211 = vmatpush3.bf16.msra.mxu0 %v73_v21 }
  0x80   :  { %v52_v24 = vpack.c.bf16 %v50_v20, %v50_v20  ;;  %v235_v26 = vpack.c.bf16 %v232_v22, %v232_v22  ;;  %1222 = vmatprep.subr.bf16.mxu0 %v1358_v6 }
  0x81   :  { %v334_v28 = vpop.permute.xlu0 %333  ;;  %v395_v35 = vpop.permute.xlu1 %394 }
  0x82   :  { %1213 = vmatmul.mubr.msk.bf16.vlgmr.msra.gmra.mxu0 %vm67_vm2, %v1128_v23  ;;  %v119_v29 = vsel %vm71_vm1, %v52_v24, 0  ;;  %v240_v31 = vsel %vm71_vm1, %v235_v26, 0  ;;  %v343_v32 = vmul.f32 %v1484_v27, %v334_v28  ;;  %v404_v39 = vmul.f32 %v1502_v34, %v395_v35 }
  0x83   :  { %1217 = vmatpush3.bf16.msra.mxu1 %v119_v29  ;;  %1223 = vmatpush3.bf16.msra.mxu0 %v179_v25 }
  0x84   :  { %1224 = vmatprep.mubr.msk.bf16.mxu0 %vm1359_vm0, %v1358_v6  ;;  %1228 = vmatprep.subr.bf16.mxu1 %v1358_v6  ;;  %v346_v37 = vpack.c.bf16 %v343_v32, %v343_v32  ;;  %v407_v44 = vpack.c.bf16 %v404_v39, %v404_v39 }
  0x85   :  { %1234 = vmatprep.subr.bf16.mxu0 %v1358_v6  ;;  %v456_v41 = vpop.permute.xlu0 %455  ;;  %v517_v47 = vpop.permute.xlu1 %516 }
  0x86   :  { %1219 = vmatmul.mubr.msk.bf16.vlgmr.msra.gmra.mxu1 %vm67_vm2, %v51_v30  ;;  %v351_v43 = vsel %vm71_vm1, %v346_v37, 0  ;;  %v465_v45 = vmul.f32 %v1516_v40, %v456_v41  ;;  %v412_v49 = vsel %vm71_vm1, %v407_v44, 0  ;;  %v526_v51 = vmul.f32 %v1530_v46, %v517_v47 }
  0x87   :  { %1229 = vmatpush3.bf16.msra.mxu1 %v240_v31  ;;  %1230 = vmatprep.mubr.msk.bf16.mxu1 %vm1359_vm0, %v1358_v6 }
  0x88   :  { %1240 = vmatprep.subr.bf16.mxu1 %v1358_v6  ;;  %v468_v50 = vpack.c.bf16 %v465_v45, %v465_v45  ;;  %v529_v54 = vpack.c.bf16 %v526_v51, %v526_v51 }
  0x8a   :  { %1225 = vmatmul.mubr.msk.bf16.vlgmr.msra.gmra.mxu0 %vm67_vm2, %v1133_v36  ;;  %v473_v53 = vsel %vm71_vm1, %v468_v50, 0  ;;  %v534_v56 = vsel %vm71_vm1, %v529_v54, 0 }
  0x8b   :  { %1235 = vmatpush3.bf16.msra.mxu0 %v290_v38  ;;  %1236 = vmatprep.mubr.msk.bf16.mxu0 %vm1359_vm0, %v1358_v6 }
  0x8c   :  { %1246 = vmatprep.subr.bf16.mxu0 %v1358_v6 }
  0x8e   :  { %1231 = vmatmul.mubr.msk.bf16.vlgmr.msra.gmra.mxu1 %vm67_vm2, %v1137_v42 }
  0x8f   :  { %1241 = vmatpush3.bf16.msra.mxu1 %v351_v43  ;;  %1242 = vmatprep.mubr.msk.bf16.mxu1 %vm1359_vm0, %v1358_v6 }
  0x90   :  { %1252 = vmatprep.subr.bf16.mxu1 %v1358_v6 }
  0x92   :  { %1237 = vmatmul.mubr.msk.bf16.vlgmr.msra.gmra.mxu0 %vm67_vm2, %v1139_v48 }
  0x93   :  { %1247 = vmatpush3.bf16.msra.mxu0 %v412_v49  ;;  %1248 = vmatprep.mubr.msk.bf16.mxu0 %vm1359_vm0, %v1358_v6 }
  0x94   :  { %1258 = vmatprep.subr.bf16.mxu0 %v1358_v6 }
  0x96   :  { %1243 = vmatmul.mubr.msk.bf16.vlgmr.msra.gmra.mxu1 %vm67_vm2, %v1143_v52  ;;  %v1368_v52 = vmov 0  }
  0x97   :  { %1253 = vmatpush3.bf16.msra.mxu1 %v473_v53  ;;  %1254 = vmatprep.mubr.msk.bf16.mxu1 %vm1359_vm0, %v1358_v6 }
  0x98   :  { %1264 = vmatprep.subr.bf16.mxu1 %v1358_v6  ;;  %1330 = vset.pattern.permute.xlu0 %v1368_v52 }
  0x99   :  { %1331 = vset.pattern.permute.xlu1 %v1368_v52 }
  0x9a   :  { %1249 = vmatmul.mubr.msk.bf16.vlgmr.msra.gmra.mxu0 %vm67_vm2, %v1147_v55 }
  0x9b   :  { %1259 = vmatpush3.bf16.msra.mxu0 %v534_v56  ;;  %1260 = vmatprep.mubr.msk.bf16.mxu0 %vm1359_vm0, %v1358_v6  ;;  %v586_v56 = vld [vmem:[%s1673_s3] sm:$0xff] }
  0x9c   :  { %1270 = vmatprep.subr.bf16.mxu0 %v1358_v6 }
  0x9e   :  { %1255 = vmatmul.mubr.msk.bf16.vlgmr.msra.gmra.mxu1 %vm67_vm2, %v1151_v57 }
  0x9f   :  { %1266 = vmatprep.mubr.msk.bf16.mxu1 %vm1359_vm0, %v1358_v6 }
  0xa2   :  { %1261 = vmatmul.mubr.msk.bf16.vlgmr.msra.gmra.mxu0 %vm67_vm2, %v1155_v58 }
  0xa3   :  { %1272 = vmatprep.mubr.msk.bf16.mxu0 %vm1359_vm0, %v1358_v6 }
 0x142   :  { %v109_v59 = vpop.f32.mrf.mxu0 }
 0x144   :  { %v1214_v60 = vpop.f32.mrf.mxu0 }
 0x146   :  { %v112_v61 = vpop.f32.mrf.mxu0  ;;  %v155_v62 = vpop.f32.mrf.mxu1 }
 0x147   :  { %v156_v18 = vadd.f32 %v155_v62, %v109_v59  ;;  %v590_v59 = vld [vmem:[%s1674_s4] sm:$0xff] }
 0x148   :  { %v1215_v63 = vpop.f32.mrf.mxu0  ;;  %v1220_v0 = vpop.f32.mrf.mxu1 }
 0x14a   :  { %v158_v1 = vpop.f32.mrf.mxu1  ;;  %v215_v2 = vpop.f32.mrf.mxu0 }
 0x14b   :  { %v221_v21 = vadd.f32 %v215_v2, %v156_v18 }
 0x14c   :  { %v1221_v3 = vpop.f32.mrf.mxu1  ;;  %v1226_v4 = vpop.f32.mrf.mxu0 }
 0x14e   :  { %v218_v5 = vpop.f32.mrf.mxu0  ;;  %v276_v7 = vpop.f32.mrf.mxu1 }
 0x14f   :  { %v282_v24 = vadd.f32 %v276_v7, %v221_v21 }
 0x150   :  { %v1227_v10 = vpop.f32.mrf.mxu0  ;;  %v1232_v11 = vpop.f32.mrf.mxu1 }
 0x152   :  { %v279_v12 = vpop.f32.mrf.mxu1  ;;  %v326_v13 = vpop.f32.mrf.mxu0 }
 0x153   :  { %v332_v28 = vadd.f32 %v326_v13, %v282_v24  ;;  %v1157_v12 = vld [vmem:[%s1675_s5 + $0x4] sm:$0xf] }
 0x154   :  { %v1233_v16 = vpop.f32.mrf.mxu1  ;;  %v1238_v17 = vpop.f32.mrf.mxu0 }
 0x156   :  { %v329_v19 = vpop.f32.mrf.mxu0  ;;  %v387_v20 = vpop.f32.mrf.mxu1 }
 0x157   :  { %v393_v31 = vadd.f32 %v387_v20, %v332_v28 }
 0x158   :  { %v1239_v22 = vpop.f32.mrf.mxu0  ;;  %v1244_v23 = vpop.f32.mrf.mxu1 }
 0x159   :  { %v1160_v22 = vld [vmem:[%s1675_s5 + $0x8] sm:$0xf] }
 0x15a   :  { %v390_v25 = vpop.f32.mrf.mxu1  ;;  %v448_v26 = vpop.f32.mrf.mxu0 }
 0x15b   :  { %v454_v35 = vadd.f32 %v448_v26, %v393_v31 }
 0x15c   :  { %v1245_v29 = vpop.f32.mrf.mxu1  ;;  %v1250_v30 = vpop.f32.mrf.mxu0 }
 0x15d   :  { %v1162_v29 = vld [vmem:[%s1675_s5 + $0xc] sm:$0xf] }
 0x15e   :  { %v451_v32 = vpop.f32.mrf.mxu0  ;;  %v509_v33 = vpop.f32.mrf.mxu1 }
 0x15f   :  { %v515_v38 = vadd.f32 %v509_v33, %v454_v35  ;;  %v1164_v35 = vld [vmem:[%s1675_s5 + $0x10] sm:$0xf] }
 0x160   :  { %v1251_v36 = vpop.f32.mrf.mxu0  ;;  %v1256_v37 = vpop.f32.mrf.mxu1 }
 0x162   :  { %v512_v39 = vpop.f32.mrf.mxu1  ;;  %v570_v41 = vpop.f32.mrf.mxu0 }
 0x163   :  { %v576_v42 = vadd.f32 %v570_v41, %v515_v38 }
 0x164   :  { %v1257_v43 = vpop.f32.mrf.mxu1  ;;  %v1262_v44 = vpop.f32.mrf.mxu0 }
 0x165   :  { %577 = vadd.xlane.f32.xlu0 %v576_v42  ;;  %v1170_v44 = vld [vmem:[%s1675_s5 + $0x1c] sm:$0xf] }
 0x166   :  { %v573_v45 = vpop.f32.mrf.mxu0 }
 0x167   :  { %v1172_v45 = vld [vmem:[%s1675_s5 + $0x20] sm:$0xf] }
 0x168   :  { %v1263_v47 = vpop.f32.mrf.mxu0 }
 0x1ee   :  { %v578_v48 = vpop.xlane.xlu0 %577 }
 0x1ef   :  { %v580_v49 = vmul.f32 0.0078125, %v578_v48 }
 0x1f1   :  { %v581_v50 = vsub.f32 %v576_v42, %v580_v49 }
 0x1f3   :  { %v582_v51 = vmul.f32 %v581_v50, %v581_v50 }
 0x1f5   :  { %583 = vadd.xlane.f32.xlu1 %v582_v51 }
 0x27e   :  { %v584_v53 = vpop.xlane.xlu1 %583 }
 0x27f   :  { %v585_v54 = vmul.f32 0.0078125, %v584_v53 }
 0x281   :  { %v587_v55 = vadd.f32 1e-05, %v585_v54 }
 0x283   :  { %1332 = vrsqrt.f32 %v587_v55 }
 0x290   :  { %v1333_v57 = vpop.eup %1332 }
 0x291   :  { %v589_v58 = vmul.f32 %v1333_v57, %v586_v56 }
 0x293   :  { %595 = vperm.xlu0 %1330, %v589_v58   ;;  %v591_v60 = vmul.f32 %v589_v58, %v580_v49 }
 0x295   :  { %v592_v61 = vsub.f32 %v590_v59, %v591_v60 }
 0x297   :  { %601 = vperm.xlu1 %1331, %v592_v61  }
 0x30e   :  { %v596_v62 = vpop.permute.xlu0 %595 }
 0x30f   :  { %v598_v63 = vmul.f32 %v596_v62, %v576_v42 }
 0x312   :  { %v602_v0 = vpop.permute.xlu1 %601 }
 0x313   :  { %v604_v1 = vadd.f32 %v602_v0, %v598_v63 }
 0x315   :  { %v605_v2 = vmax.f32 %v604_v1, 0.0 }
 0x317   :  { %973 = vrot.lane.b32.xlu0 %v605_v2, %s1366_s18  ;;  %611 = vrot.lane.b32.xlu1 %v605_v2, %s1360_s13 }
 0x31b   :  { %606 = vrot.lane.b32.xlu1 %v605_v2, %s1362_s14 }
 0x31f   :  { %711 = vrot.lane.b32.xlu1 %v605_v2, %s1361_s0 }
 0x323   :  { %764 = vrot.lane.b32.xlu1 %v605_v2, %s1363_s15 }
 0x327   :  { %867 = vrot.lane.b32.xlu1 %v605_v2, %s1364_s16 }
 0x32b   :  { %920 = vrot.lane.b32.xlu1 %v605_v2, %s1365_s17 }
 0x32f   :  { %1026 = vrot.lane.b32.xlu1 %v605_v2, %s1367_s19 }
 0x389   :  { %v612_v3 = vpop.permute.xlu1 %611  ;;  %v974_v28 = vpop.permute.xlu0 %973 }
 0x38a   :  { %v613_v4 = vmul.f32 %v1454_v8, %v612_v3 }
 0x38c   :  { %v616_v5 = vpack.c.bf16 %v613_v4, %v613_v4 }
 0x38d   :  { %v607_v7 = vpop.permute.xlu1 %606 }
 0x38e   :  { %v623_v10 = vsel %vm621_vm3, %v616_v5, 0  ;;  %v608_v11 = vmul.f32 %v1466_v14, %v607_v7  ;;  %v609_v14 = vld [vmem:[%s1675_s5] sm:$0xf] }
 0x38f   :  { %1265 = vmatpush3.bf16.msra.mxu1 %v623_v10 }
 0x390   :  { %v610_v13 = vpack.c.bf16 %v608_v11, %v608_v11  ;;  %1276 = vmatprep.subr.bf16.mxu1 %v1358_v6 }
 0x391   :  { %v712_v16 = vpop.permute.xlu1 %711 }
 0x392   :  { %v669_v17 = vsel %vm621_vm3, %v610_v13, 0  ;;  %v713_v8 = vmul.f32 %v1459_v9, %v712_v16  ;;  %1267 = vmatmul.mubr.msk.bf16.vlgmr.msra.gmra.mxu1 %vm617_vm4, %v1157_v12  ;;  %v819_v9 = vpack.c.bf16 %v605_v2, %v605_v2 }
 0x393   :  { %1271 = vmatpush3.bf16.msra.mxu0 %v669_v17  ;;  %1278 = vmatprep.mubr.msk.bf16.mxu1 %vm1359_vm0, %v1358_v6 }
 0x394   :  { %v716_v18 = vpack.c.bf16 %v713_v8, %v713_v8  ;;  %1282 = vmatprep.subr.bf16.mxu0 %v1358_v6 }
 0x395   :  { %v765_v19 = vpop.permute.xlu1 %764 }
 0x396   :  { %v721_v20 = vsel %vm621_vm3, %v716_v18, 0  ;;  %v766_v21 = vmul.f32 %v1471_v15, %v765_v19  ;;  %1273 = vmatmul.mubr.msk.bf16.vlgmr.msra.gmra.mxu0 %vm617_vm4, %v609_v14  ;;  %v824_v15 = vsel %vm621_vm3, %v819_v9, 0 }
 0x397   :  { %1277 = vmatpush3.bf16.msra.mxu1 %v721_v20  ;;  %1284 = vmatprep.mubr.msk.bf16.mxu0 %vm1359_vm0, %v1358_v6 }
 0x398   :  { %v769_v23 = vpack.c.bf16 %v766_v21, %v766_v21  ;;  %1288 = vmatprep.subr.bf16.mxu1 %v1358_v6 }
 0x399   :  { %v868_v24 = vpop.permute.xlu1 %867 }
 0x39a   :  { %v774_v25 = vsel %vm621_vm3, %v769_v23, 0  ;;  %v869_v26 = vmul.f32 %v1484_v27, %v868_v24  ;;  %1279 = vmatmul.mubr.msk.bf16.vlgmr.msra.gmra.mxu1 %vm617_vm4, %v1160_v22  ;;  %v975_v27 = vmul.f32 %v1516_v40, %v974_v28 }
 0x39b   :  { %1283 = vmatpush3.bf16.msra.mxu0 %v774_v25  ;;  %1289 = vmatpush3.bf16.msra.mxu1 %v824_v15 }
 0x39c   :  { %v872_v30 = vpack.c.bf16 %v869_v26, %v869_v26  ;;  %1294 = vmatprep.subr.bf16.mxu0 %v1358_v6  ;;  %1290 = vmatprep.mubr.msk.bf16.mxu1 %vm1359_vm0, %v1358_v6  ;;  %v978_v38 = vpack.c.bf16 %v975_v27, %v975_v27 }
 0x39d   :  { %v921_v31 = vpop.permute.xlu1 %920  ;;  %1300 = vmatprep.subr.bf16.mxu1 %v1358_v6 }
 0x39e   :  { %v877_v32 = vsel %vm621_vm3, %v872_v30, 0  ;;  %v922_v33 = vmul.f32 %v1502_v34, %v921_v31  ;;  %1285 = vmatmul.mubr.msk.bf16.vlgmr.msra.gmra.mxu0 %vm617_vm4, %v1162_v29  ;;  %v1166_v34 = vld [vmem:[%s1675_s5 + $0x14] sm:$0xf]  ;;  %v983_v41 = vsel %vm621_vm3, %v978_v38, 0  ;;  %v1091_v38 = vld [vmem:[%s1677_s7] sm:$0xff] }
 0x39f   :  { %1295 = vmatpush3.bf16.msra.mxu0 %v877_v32  ;;  %1296 = vmatprep.mubr.msk.bf16.mxu0 %vm1359_vm0, %v1358_v6 }
 0x3a0   :  { %v925_v36 = vpack.c.bf16 %v922_v33, %v922_v33  ;;  %1306 = vmatprep.subr.bf16.mxu0 %v1358_v6 }
 0x3a1   :  { %v1027_v37 = vpop.permute.xlu1 %1026 }
 0x3a2   :  { %v930_v40 = vsel %vm621_vm3, %v925_v36, 0  ;;  %v1028_v39 = vmul.f32 %v1530_v46, %v1027_v37  ;;  %1291 = vmatmul.mubr.msk.bf16.vlgmr.msra.gmra.mxu1 %vm617_vm4, %v1164_v35  ;;  %v1168_v46 = vld [vmem:[%s1675_s5 + $0x18] sm:$0xf]  ;;  %v1087_v35 = vld [vmem:[%s1676_s6] sm:$0xff]  ;;  %s1336_s6 = scalar_lea.vmem %s1115_s22, 128 }
 0x3a3   :  { %1301 = vmatpush3.bf16.msra.mxu1 %v930_v40  ;;  %1302 = vmatprep.mubr.msk.bf16.mxu1 %vm1359_vm0, %v1358_v6  ;;  %p1337_p0 = scmp.ne.s32.totalorder %s1115_s22, %s1336_s6  ;;  %p1342_p2 = scmp.lt.s32.totalorder %s1336_s6, %s1336_s6 }
 0x3a4   :  { %1312 = vmatprep.subr.bf16.mxu1 %v1358_v6  ;;  %v1031_v42 = vpack.c.bf16 %v1028_v39, %v1028_v39 }
 0x3a5   :  { %p1343_p3 = por %p1342_p2, %p1341_p1 }
 0x3a6   :  { %1297 = vmatmul.mubr.msk.bf16.vlgmr.msra.gmra.mxu0 %vm617_vm4, %v1166_v34  ;;  %v1036_v43 = vsel %vm621_vm3, %v1031_v42, 0 }
 0x3a7   :  { %1307 = vmatpush3.bf16.msra.mxu0 %v983_v41  ;;  %1308 = vmatprep.mubr.msk.bf16.mxu0 %vm1359_vm0, %v1358_v6  ;;  %p1344_p4 = pnand %p1343_p3, %p1337_p0 }
 0x3aa   :  { %1303 = vmatmul.mubr.msk.bf16.vlgmr.msra.gmra.mxu1 %vm617_vm4, %v1168_v46 }
 0x3ab   :  { %1313 = vmatpush3.bf16.msra.mxu1 %v1036_v43  ;;  %1314 = vmatprep.mubr.msk.bf16.mxu1 %vm1359_vm0, %v1358_v6 }
 0x3ae   :  { %1309 = vmatmul.mubr.msk.bf16.vlgmr.msra.gmra.mxu0 %vm617_vm4, %v1170_v44 }
 0x3b2   :  { %1315 = vmatmul.mubr.msk.bf16.vlgmr.msra.gmra.mxu1 %vm617_vm4, %v1172_v45 }
 0x452   :  { %v659_v47 = vpop.f32.mrf.mxu1 }
 0x454   :  { %v1268_v48 = vpop.f32.mrf.mxu1 }
 0x456   :  { %v662_v49 = vpop.f32.mrf.mxu1  ;;  %v705_v50 = vpop.f32.mrf.mxu0 }
 0x457   :  { %v706_v0 = vadd.f32 %v705_v50, %v659_v47 }
 0x458   :  { %v1269_v51 = vpop.f32.mrf.mxu1  ;;  %v1274_v52 = vpop.f32.mrf.mxu0 }
 0x45a   :  { %v708_v53 = vpop.f32.mrf.mxu0  ;;  %v757_v54 = vpop.f32.mrf.mxu1 }
 0x45b   :  { %v763_v3 = vadd.f32 %v757_v54, %v706_v0 }
 0x45c   :  { %v1275_v55 = vpop.f32.mrf.mxu0  ;;  %v1280_v56 = vpop.f32.mrf.mxu1 }
 0x45e   :  { %v760_v57 = vpop.f32.mrf.mxu1  ;;  %v810_v6 = vpop.f32.mrf.mxu0 }
 0x45f   :  { %v816_v7 = vadd.f32 %v810_v6, %v763_v3 }
 0x460   :  { %v1281_v58 = vpop.f32.mrf.mxu1  ;;  %v1286_v59 = vpop.f32.mrf.mxu0 }
 0x462   :  { %v813_v60 = vpop.f32.mrf.mxu0  ;;  %v860_v61 = vpop.f32.mrf.mxu1 }
 0x463   :  { %v866_v12 = vadd.f32 %v860_v61, %v816_v7 }
 0x464   :  { %v1287_v62 = vpop.f32.mrf.mxu0  ;;  %v1292_v63 = vpop.f32.mrf.mxu1 }
 0x466   :  { %v863_v1 = vpop.f32.mrf.mxu1  ;;  %v913_v2 = vpop.f32.mrf.mxu0 }
 0x467   :  { %v919_v17 = vadd.f32 %v913_v2, %v866_v12 }
 0x468   :  { %v1293_v4 = vpop.f32.mrf.mxu1  ;;  %v1298_v5 = vpop.f32.mrf.mxu0 }
 0x46a   :  { %v916_v10 = vpop.f32.mrf.mxu0  ;;  %v966_v11 = vpop.f32.mrf.mxu1 }
 0x46b   :  { %v972_v18 = vadd.f32 %v966_v11, %v919_v17 }
 0x46c   :  { %v1299_v13 = vpop.f32.mrf.mxu0  ;;  %v1304_v16 = vpop.f32.mrf.mxu1 }
 0x46e   :  { %v969_v8 = vpop.f32.mrf.mxu1  ;;  %v1019_v14 = vpop.f32.mrf.mxu0 }
 0x46f   :  { %v1025_v21 = vadd.f32 %v1019_v14, %v972_v18 }
 0x470   :  { %v1305_v19 = vpop.f32.mrf.mxu1  ;;  %v1310_v20 = vpop.f32.mrf.mxu0 }
 0x472   :  { %v1072_v9 = vpop.f32.mrf.mxu1  ;;  %v1022_v22 = vpop.f32.mrf.mxu0 }
 0x473   :  { %v1078_v23 = vadd.f32 %v1072_v9, %v1025_v21 }
 0x474   :  { %v1316_v24 = vpop.f32.mrf.mxu1  ;;  %v1311_v25 = vpop.f32.mrf.mxu0 }
 0x475   :  { %1079 = vadd.xlane.f32.xlu0 %v1078_v23 }
 0x476   :  { %v1075_v26 = vpop.f32.mrf.mxu1 }
 0x478   :  { %v1317_v15 = vpop.f32.mrf.mxu1 }
 0x4fe   :  { %v1080_v28 = vpop.xlane.xlu0 %1079 }
 0x4ff   :  { %v1081_v29 = vmul.f32 0.0078125, %v1080_v28 }
 0x501   :  { %v1082_v30 = vsub.f32 %v1078_v23, %v1081_v29 }
 0x503   :  { %v1083_v31 = vmul.f32 %v1082_v30, %v1082_v30 }
 0x505   :  { %1084 = vadd.xlane.f32.xlu1 %v1083_v31 }
 0x58e   :  { %v1085_v27 = vpop.xlane.xlu1 %1084 }
 0x58f   :  { %v1086_v32 = vmul.f32 0.0078125, %v1085_v27 }
 0x591   :  { %v1088_v33 = vadd.f32 1e-05, %v1086_v32 }
 0x593   :  { %1334 = vrsqrt.f32 %v1088_v33 }
 0x5a0   :  { %v1335_v36 = vpop.eup %1334 }
 0x5a1   :  { %v1090_v37 = vmul.f32 %v1335_v36, %v1087_v35 }
 0x5a3   :  { %1096 = vperm.xlu0 %1330, %v1090_v37   ;;  %v1092_v40 = vmul.f32 %v1090_v37, %v1081_v29 }
 0x5a5   :  { %v1093_v39 = vsub.f32 %v1091_v38, %v1092_v40 }
 0x5a7   :  { %1102 = vperm.xlu1 %1331, %v1093_v39  }
 0x61e   :  { %v1097_v34 = vpop.permute.xlu0 %1096 }
 0x61f   :  { %v1099_v41 = vmul.f32 %v1097_v34, %v1078_v23 }
 0x622   :  { %v1103_v42 = vpop.permute.xlu1 %1102 }
 0x623   :  { %v1105_v46 = vadd.f32 %v1103_v42, %v1099_v41 }
 0x625   :  { %v1106_v43 = vmax.f32 %v1105_v46, 0.0 }
 0x627   :  { %1107 = vst [vmem:[#allocation2] sm:$0xff] %v1106_v43 }
 0x628   :  { %1347 = shalt.err (!%p1344_p4)
}
 0x629   :  { %1117 = dma.vmem_to_hbm [thread:$0]  %s1115_s22, 128, %s1678_s8, [#allocation3]  }
 0x62a   :  { %1356 = dma.done.wait [#allocation3], 128  }
 0x62b   :  { %1357 = vsyncadd [#allocation3], 4294967168 }
 0x62c   :  { %1121 = vsyncpa [#allocation3], 1 }

</bundles_post_ra>
